<compile_context>
chip_gen: v7x
topology: tpu7x:2x2x1
jax: 0.10.0
libtpu: 0.0.40
codegen_flags: <defaults>
</compile_context>

<pallas_src>
import jax
import jax.numpy as jnp
from jax.experimental import pallas as pl
from jax.experimental.pallas import tpu as pltpu

batch_size = 1
hidden_size = 4
input_size = 4
seq_len = 8  # used only for the fused-sequence demo


def _rnncell_kernel(x_ref, h0_ref, w_ref, b_ref, o_ref, xh_scratch):
    """One grid step == one RNNCell time step.

    x_ref      : (1, B, I)  current input tile
    h0_ref     : (B, H)     initial hidden (read only at t == 0)
    w_ref      : (I+H, H)   stacked, pre-transposed weights [W_ih^T ; W_hh^T]
    b_ref      : (1, H)     pre-summed bias (b_ih + b_hh)
    o_ref      : (1, B, H)  hidden state emitted for this step
    xh_scratch : (B, I+H)   VMEM scratch; columns [I:] carry h between grid steps
    """
    t = pl.program_id(0)
    in_dim = x_ref.shape[-1]

    @pl.when(t == 0)
    def _init():
        xh_scratch[:, in_dim:] = h0_ref[...]

    # Write current x into the fused operand; h part already holds previous hidden.
    xh_scratch[:, :in_dim] = x_ref[0]

    pre = jnp.dot(xh_scratch[...], w_ref[...],
                  preferred_element_type=jnp.float32) + b_ref[...]
    h_new = jnp.tanh(pre)

    # Carry hidden to the next grid step and emit it.
    xh_scratch[:, in_dim:] = h_new
    o_ref[0] = h_new.astype(o_ref.dtype)


def prepare_params(w_ih, w_hh, b_ih, b_hh):
    """One-time parameter prep: stack pre-transposed weights, pre-sum biases."""
    w_stacked = jnp.concatenate([w_ih.T, w_hh.T], axis=0).astype(jnp.float32)  # (I+H, H)
    b = (b_ih + b_hh).reshape(1, -1).astype(jnp.float32)                       # (1, H)
    return w_stacked, b


def rnncell_sequence(x_seq, h0, w_stacked, b):
    """Run T RNNCell steps inside a single pallas_call. Returns all hidden states (T,B,H)."""
    T, B, I = x_seq.shape
    H = w_stacked.shape[1]
    return pl.pallas_call(
        _rnncell_kernel,
        out_shape=jax.ShapeDtypeStruct((T, B, H), jnp.float32),
        grid=(T,),
        in_specs=[
            pl.BlockSpec((1, B, I), lambda t: (t, 0, 0)),    # x: streamed per step
            pl.BlockSpec((B, H), lambda t: (0, 0)),          # h0: resident
            pl.BlockSpec((I + H, H), lambda t: (0, 0)),      # weights: resident
            pl.BlockSpec((1, H), lambda t: (0, 0)),          # bias: resident
        ],
        out_specs=pl.BlockSpec((1, B, H), lambda t: (t, 0, 0)),
        scratch_shapes=[pltpu.VMEM((B, I + H), jnp.float32)],
        compiler_params=pltpu.CompilerParams(
            dimension_semantics=("arbitrary",),              # time axis is a carried loop
        ),
    )(x_seq, h0, w_stacked, b)


def rnncell_forward(x, h, w_stacked, b):
    """Single RNNCell step (== the PyTorch Model.forward). Implemented as a length-1 sequence."""
    return rnncell_sequence(x[None], h, w_stacked, b)[0]


def reference_step(x, h, w_ih, w_hh, b_ih, b_hh):
    return jnp.tanh(x @ w_ih.T + b_ih + h @ w_hh.T + b_hh)


if __name__ == "__main__":
    key = jax.random.PRNGKey(0)
    k_x, k_xs, k_wih, k_whh, k_bih, k_bhh = jax.random.split(key, 6)

    # PyTorch-style init: uniform(-1/sqrt(H), 1/sqrt(H)).
    bound = 1.0 / jnp.sqrt(jnp.float32(hidden_size))
    w_ih = jax.random.uniform(k_wih, (hidden_size, input_size), jnp.float32, -bound, bound)
    w_hh = jax.random.uniform(k_whh, (hidden_size, hidden_size), jnp.float32, -bound, bound)
    b_ih = jax.random.uniform(k_bih, (hidden_size,), jnp.float32, -bound, bound)
    b_hh = jax.random.uniform(k_bhh, (hidden_size,), jnp.float32, -bound, bound)

    w_stacked, b_fused = prepare_params(w_ih, w_hh, b_ih, b_hh)

    # --- single-step forward (exactly the PyTorch Model.forward semantics) ---
    x = jax.random.normal(k_x, (batch_size, input_size), jnp.float32)
    h0 = jnp.zeros((batch_size, hidden_size), jnp.float32)  # Model.init_hidden()

    out = jax.block_until_ready(rnncell_forward(x, h0, w_stacked, b_fused))
    ref = reference_step(x, h0, w_ih, w_hh, b_ih, b_hh)
    assert out.shape == (batch_size, hidden_size)
    assert jnp.allclose(out, ref, atol=1e-5, rtol=1e-5)

    # --- fused T-step sequence: one pallas_call, weights resident in VMEM ---
    x_seq = jax.random.normal(k_xs, (seq_len, batch_size, input_size), jnp.float32)
    out_seq = jax.block_until_ready(rnncell_sequence(x_seq, h0, w_stacked, b_fused))
    assert out_seq.shape == (seq_len, batch_size, hidden_size)

    ref_h = h0
    for t in range(seq_len):
        ref_h = reference_step(x_seq[t], ref_h, w_ih, w_hh, b_ih, b_hh)
        assert jnp.allclose(out_seq[t], ref_h, atol=1e-5, rtol=1e-5)

    print("KERNEL_OK")
</pallas_src>

<mosaic_0001>
module attributes {stable_mosaic.version = 11 : i64} {
  func.func @_rnncell_kernel(%arg0: i32, %arg1: memref<1x1x4xf32, #tpu.memory_space<vmem>>, %arg2: memref<1x4xf32, #tpu.memory_space<vmem>>, %arg3: memref<8x4xf32, #tpu.memory_space<vmem>>, %arg4: memref<1x4xf32, #tpu.memory_space<vmem>>, %arg5: memref<1x1x4xf32, #tpu.memory_space<vmem>>, %arg6: memref<1x8xf32, #tpu.memory_space<vmem>>) attributes {dimension_semantics = [#tpu.dimension_semantics<arbitrary>], iteration_bounds = array<i64: 1>, scalar_prefetch = 0 : i64, scratch_operands = 1 : i64, tpu.core_type = #tpu.core_type<tc>, window_params = [{transform_indices = @transform_0, window_bounds = array<i64: 1, 1, 4>}, {pipeline_mode = #tpu.pipeline_mode<synchronous>, transform_indices = @transform_1, window_bounds = array<i64: 1, 4>}, {pipeline_mode = #tpu.pipeline_mode<synchronous>, transform_indices = @transform_2, window_bounds = array<i64: 8, 4>}, {pipeline_mode = #tpu.pipeline_mode<synchronous>, transform_indices = @transform_3, window_bounds = array<i64: 1, 4>}, {transform_indices = @transform_4, window_bounds = array<i64: 1, 1, 4>}]} {
    %c0_i32 = arith.constant 0 : i32
    %0 = arith.cmpi eq, %arg0, %c0_i32 : i32
    %1 = arith.extui %0 : i1 to i32
    %c0_i32_0 = arith.constant 0 : i32
    %2 = arith.cmpi ne, %1, %c0_i32_0 : i32
    scf.if %2 {
      %c0_15 = arith.constant 0 : index
      %c0_16 = arith.constant 0 : index
      %16 = vector.load %arg2[%c0_15, %c0_16] : memref<1x4xf32, #tpu.memory_space<vmem>>, vector<1x4xf32>
      %c0_17 = arith.constant 0 : index
      %c4_18 = arith.constant 4 : index
      %17 = vector.load %arg6[%c0_17, %c4_18] : memref<1x8xf32, #tpu.memory_space<vmem>>, vector<1x4xf32>
      tpu.vector_store %arg6[%c0_17, %c4_18], %16 {strides = array<i32>} : memref<1x8xf32, #tpu.memory_space<vmem>>, vector<1x4xf32>,
    } else {
    }
    %c0 = arith.constant 0 : index
    %c0_1 = arith.constant 0 : index
    %c0_2 = arith.constant 0 : index
    %3 = vector.load %arg1[%c0, %c0_1, %c0_2] : memref<1x1x4xf32, #tpu.memory_space<vmem>>, vector<1x1x4xf32>
    %4 = vector.shape_cast %3 : vector<1x1x4xf32> to vector<1x4xf32>
    %c0_3 = arith.constant 0 : index
    %c0_4 = arith.constant 0 : index
    %5 = vector.load %arg6[%c0_3, %c0_4] : memref<1x8xf32, #tpu.memory_space<vmem>>, vector<1x4xf32>
    tpu.vector_store %arg6[%c0_3, %c0_4], %4 {strides = array<i32>} : memref<1x8xf32, #tpu.memory_space<vmem>>, vector<1x4xf32>,
    %c0_5 = arith.constant 0 : index
    %c0_6 = arith.constant 0 : index
    %6 = vector.load %arg6[%c0_5, %c0_6] : memref<1x8xf32, #tpu.memory_space<vmem>>, vector<1x8xf32>
    %c0_7 = arith.constant 0 : index
    %c0_8 = arith.constant 0 : index
    %7 = vector.load %arg3[%c0_7, %c0_8] : memref<8x4xf32, #tpu.memory_space<vmem>>, vector<8x4xf32>
    %cst = arith.constant dense<0.000000e+00> : vector<1x4xf32>
    %8 = tpu.matmul %6, %7, %cst {dimension_numbers = #tpu.dot_dimension_numbers<[1], [0], [0], [1], [0, 0, 1, 1], [], []>} : vector<1x8xf32>, vector<8x4xf32>, vector<1x4xf32> -> vector<1x4xf32>
    %c0_9 = arith.constant 0 : index
    %c0_10 = arith.constant 0 : index
    %9 = vector.load %arg4[%c0_9, %c0_10] : memref<1x4xf32, #tpu.memory_space<vmem>>, vector<1x4xf32>
    %10 = arith.addf %8, %9 : vector<1x4xf32>
    %11 = math.tanh %10 : vector<1x4xf32>
    %c0_11 = arith.constant 0 : index
    %c4 = arith.constant 4 : index
    %12 = vector.load %arg6[%c0_11, %c4] : memref<1x8xf32, #tpu.memory_space<vmem>>, vector<1x4xf32>
    tpu.vector_store %arg6[%c0_11, %c4], %11 {strides = array<i32>} : memref<1x8xf32, #tpu.memory_space<vmem>>, vector<1x4xf32>,
    %c0_12 = arith.constant 0 : index
    %c0_13 = arith.constant 0 : index
    %c0_14 = arith.constant 0 : index
    %13 = vector.load %arg5[%c0_12, %c0_13, %c0_14] : memref<1x1x4xf32, #tpu.memory_space<vmem>>, vector<1x1x4xf32>
    %14 = vector.shape_cast %13 : vector<1x1x4xf32> to vector<1x4xf32>
    %15 = vector.shape_cast %11 : vector<1x4xf32> to vector<1x1x4xf32>
    tpu.vector_store %arg5[%c0_12, %c0_13, %c0_14], %15 {strides = array<i32>} : memref<1x1x4xf32, #tpu.memory_space<vmem>>, vector<1x1x4xf32>,
    return
  }
  func.func @transform_0(%arg0: i32) -> (i32, i32, i32) {
    %c0_i32 = arith.constant 0 : i32
    %c0_i32_0 = arith.constant 0 : i32
    %c0_i32_1 = arith.constant 0 : i32
    return %arg0, %c0_i32, %c0_i32_0 : i32, i32, i32
  }
  func.func @transform_1(%arg0: i32) -> (i32, i32) {
    %c0_i32 = arith.constant 0 : i32
    %c0_i32_0 = arith.constant 0 : i32
    %c0_i32_1 = arith.constant 0 : i32
    return %c0_i32, %c0_i32_0 : i32, i32
  }
  func.func @transform_2(%arg0: i32) -> (i32, i32) {
    %c0_i32 = arith.constant 0 : i32
    %c0_i32_0 = arith.constant 0 : i32
    %c0_i32_1 = arith.constant 0 : i32
    return %c0_i32, %c0_i32_0 : i32, i32
  }
  func.func @transform_3(%arg0: i32) -> (i32, i32) {
    %c0_i32 = arith.constant 0 : i32
    %c0_i32_0 = arith.constant 0 : i32
    %c0_i32_1 = arith.constant 0 : i32
    return %c0_i32, %c0_i32_0 : i32, i32
  }
  func.func @transform_4(%arg0: i32) -> (i32, i32, i32) {
    %c0_i32 = arith.constant 0 : i32
    %c0_i32_0 = arith.constant 0 : i32
    %c0_i32_1 = arith.constant 0 : i32
    return %arg0, %c0_i32, %c0_i32_0 : i32, i32, i32
  }
}

</mosaic_0001>

<bundles_post_ra>
// kernel: tpu_custom_call.1
= control target key start
LH: loop header
LB: loop body
LE: loop exit
PB: predicated region body
PF: predicated region fallthrough
CT: control target
= control target key end

     0   :  { %s174_s17 = smov 4   ;;  %v175_v2 = vmov 0.0   ;;  %vm176_vm0 = vmmov 0   ;;  %s231_s0 = inlined_call_operand.vmem [shape: f32[1,1,4], index: 0, kind: input, shape index: {}]   ;;  %s232_s1 = inlined_call_operand.vmem [shape: f32[1,4], index: 1, kind: input, shape index: {}]   ;;  %s233_s2 = inlined_call_operand.vmem [shape: f32[8,4], index: 2, kind: input, shape index: {}]   ;;  %s234_s3 = inlined_call_operand.vmem [shape: f32[1,4], index: 3, kind: input, shape index: {}]   ;;  %s235_s4 = inlined_call_operand.hbm [shape: f32[1,1,4], index: 4, kind: output, shape index: {}]  }
   0x1   :  { %v135_v0 = vld [vmem:[%s232_s1] ss:$0 sm:$0xff]  ;;  %139 = vmatprep.subr.mxu0 %v175_v2  ;;  %141 = vmatprep.mubr.msk.f32.mxu0 %vm176_vm0, %v175_v2 }
   0x2   :  { %28 = vrot.lane.b32.xlu0 %v135_v0, %s174_s17  ;;  %v37_v1 = vld [vmem:[%s233_s2] sm:$0xff] }
   0x3   :  { %9 = vsyncpa [#allocation4], 0  ;;  %140 = vmatpush3.msra.mxu0 %v37_v1  ;;  %vm31_vm1 = vcmask 57376   ;;  %v33_v3 = vld [vmem:[%s231_s0] sm:$0x1]  ;;  %vm34_vm2 = vcmask 24576  }
   0x4   :  { %vm39_vm3 = vcmask 64512   ;;  %v38_v6 = vld [vmem:[%s234_s3] sm:$0x1]  ;;  %s177_s22 = smov [#allocation3]  }
   0x5   :  { %s127_s23 = sshll.u32 %s177_s22, 4  ;;  %s128_s23 = int_to_ptr.vmem [resolvable:$true] %s127_s23 }
   0x6   :  { %s150_s0 = scalar_lea.vmem %s128_s23, 16  ;;  %s154_s24 = scalar_lea.vmem %s128_s23, 32 }
   0x7   :  { %p151_p0 = scmp.ne.s32.totalorder %s128_s23, %s150_s0  ;;  %p155_p1 = scmp.lt.s32.totalorder %s128_s23, %s128_s23 }
   0x8   :  { %p156_p2 = scmp.lt.s32.totalorder %s154_s24, %s150_s0 }
   0xa   :  { %p157_p3 = por %p156_p2, %p155_p1 }
   0xc   :  { %p158_p4 = pnand %p157_p3, %p151_p0 }
  0x74   :  { %v29_v4 = vpop.permute.xlu0 %28 }
  0x75   :  { %32 = vst.msk [vmem:[#allocation2] sm:$0x1] %vm31_vm1, %v29_v4 }
  0x76   :  { %35 = vst.msk [vmem:[#allocation2] sm:$0x1] %vm34_vm2, %v33_v3 }
  0x7d   :  { %v36_v5 = vld [vmem:[#allocation2] sm:$0x1] }
  0x7e   :  { %142 = vmatmul.mubr.msk.f32.vlgmr.msra.gmra.mrb[0].mxu0 %vm39_vm3, %v36_v5 }
 0x151   :  { %v109_v7 = vpop.f32.mrb[0].mxu0 }
 0x152   :  { %v110_v8 = vadd.f32 %v109_v7, %v38_v6  ;;  %v143_v9 = vpop.f32.mrb[1].mxu0 }
 0x154   :  { %148 = vtanh.f32 %v110_v8 }
 0x15e   :  { %v149_v10 = vpop.eup %148 }
 0x15f   :  { %120 = vst.msk [vmem:[#allocation3] sm:$0x1] %vm34_vm2, %v149_v10  ;;  %115 = vrot.lane.b32.xlu0 %v149_v10, %s174_s17 }
 0x160   :  { %161 = shalt.err (!%p158_p4)
}
 0x161   :  { %s162_s26 = scalar_lea.hbm %s235_s4, 16 }
 0x162   :  { %p163_p5 = scmp.ne.s32.totalorder %s235_s4, %s162_s26  ;;  %p166_p6 = scmp.lt.u32.totalorder %s162_s26, %s235_s4 }
 0x164   :  { %p168_p7 = pnand %p166_p6, %p163_p5 }
 0x166   :  { %171 = shalt.err (!%p168_p7)
}
 0x167   :  { %130 = dma.vmem_to_hbm [thread:$0]  %s128_s23, 16, %s235_s4, [#allocation4]  }
 0x1d1   :  { %v116_v11 = vpop.permute.xlu0 %115 }
 0x1d2   :  { %119 = vst.msk [vmem:[#allocation2] sm:$0x1] %vm31_vm1, %v116_v11 }
 0x1d3   :  { %172 = dma.done.wait [#allocation4], 16  }
 0x1d4   :  { %173 = vsyncadd [#allocation4], 4294967280 }
 0x1d5   :  { %134 = vsyncpa [#allocation4], 1 }

</bundles_post_ra>
